<compile_context>
chip_gen: v5e
topology: v5e:2x2
jax: 0.10.0
libtpu: 0.0.40
codegen_flags: <defaults>
</compile_context>

<pallas_src>
import jax
import jax.numpy as jnp
from jax.experimental import pallas as pl
from jax.experimental.pallas import tpu as pltpu


def stoch_graph_kernel(theta_ref, r_ref, f_ref):
    # All refs are SMEM scalars; arithmetic stays on the scalar unit in f32.
    t = theta_ref[0]
    r = r_ref[0]
    x = t - 1.0
    x = x * x            # (theta - 1)^2
    y = x + r            # x + r
    z = y - 2.5          # y - 5/2
    f_ref[0] = z * z     # (y - 5/2)^2


@jax.jit
def stoch_graph_forward(theta, key):
    """One forward pass of StochGraph.

    theta: (1,) float32 parameter.
    key:   PRNG key; a fresh key must be supplied per call so that r is
           resampled every forward (matches `r.data = torch.randn(1)`).
    Returns f: (1,) float32.
    """
    r = jax.random.normal(key, (1,), dtype=jnp.float32)
    f = pl.pallas_call(
        stoch_graph_kernel,
        out_shape=jax.ShapeDtypeStruct((1,), jnp.float32),
        in_specs=[
            pl.BlockSpec(memory_space=pltpu.MemorySpace.SMEM),
            pl.BlockSpec(memory_space=pltpu.MemorySpace.SMEM),
        ],
        out_specs=pl.BlockSpec(memory_space=pltpu.MemorySpace.SMEM),
    )(theta.astype(jnp.float32), r)
    return f


if __name__ == "__main__":
    key = jax.random.PRNGKey(0)

    # theta = FloatTensor([input]) with input = -2
    theta = jnp.array([-2.0], dtype=jnp.float32)

    # Fresh subkey per forward => r resampled each call, like the module.
    key, sub = jax.random.split(key)
    f = stoch_graph_forward(theta, sub)
    f = jax.block_until_ready(f)

    # Pure-JAX reference using the same r sample.
    r_ref = jax.random.normal(sub, (1,), dtype=jnp.float32)
    f_ref = ((theta - 1.0) ** 2 + r_ref - 2.5) ** 2

    assert f.shape == (1,)
    assert jnp.allclose(f, f_ref, rtol=1e-6, atol=1e-6), (f, f_ref)

    print("KERNEL_OK")
</pallas_src>

<mosaic_0001>
module attributes {stable_mosaic.version = 11 : i64} {
  func.func @stoch_graph_kernel(%arg0: memref<1xf32, #tpu.memory_space<smem>>, %arg1: memref<1xf32, #tpu.memory_space<smem>>, %arg2: memref<1xf32, #tpu.memory_space<smem>>) attributes {dimension_semantics = [], scalar_prefetch = 0 : i64, scratch_operands = 0 : i64, tpu.core_type = #tpu.core_type<tc>} {
    %c0 = arith.constant 0 : index
    %0 = memref.load %arg0[%c0] : memref<1xf32, #tpu.memory_space<smem>>
    %c0_0 = arith.constant 0 : index
    %1 = memref.load %arg1[%c0_0] : memref<1xf32, #tpu.memory_space<smem>>
    %cst = arith.constant 1.000000e+00 : f32
    %2 = arith.subf %0, %cst : f32
    %3 = arith.mulf %2, %2 : f32
    %4 = arith.addf %3, %1 : f32
    %cst_1 = arith.constant 2.500000e+00 : f32
    %5 = arith.subf %4, %cst_1 : f32
    %6 = arith.mulf %5, %5 : f32
    %c0_2 = arith.constant 0 : index
    %7 = memref.load %arg2[%c0_2] : memref<1xf32, #tpu.memory_space<smem>>
    memref.store %6, %arg2[%c0_2] : memref<1xf32, #tpu.memory_space<smem>>
    return
  }
}

</mosaic_0001>

<bundles_post_ra>
// kernel: stoch_graph_forward.1
= control target key start
LH: loop header
LB: loop body
LE: loop exit
PB: predicated region body
PF: predicated region fallthrough
CT: control target
= control target key end

     0   :  { %9 = vsyncpa [#allocation5], 0  ;;  %s55_s21 = smov [#allocation4]   ;;  %s80_s0 = inlined_call_operand.<no memory space> [shape: f32[1], index: 0, kind: input, shape index: {}]   ;;  %s81_s1 = inlined_call_operand.<no memory space> [shape: f32[1], index: 1, kind: input, shape index: {}]   ;;  %s82_s2 = inlined_call_operand.hbm [shape: f32[1], index: 2, kind: output, shape index: {}]  }
   0x1   :  { %s38_s11 = sadd.f32 -1.0, %s80_s0  ;;  %s28_s18 = sshll.u32 %s82_s2, 4  ;;  %s29_s18 = int_to_ptr.hbm [resolvable:$true] %s28_s18 }
   0x3   :  { %s17_s12 = smul.f32 %s38_s11, %s38_s11 }
   0x5   :  { %s18_s15 = sadd.f32 %s17_s12, %s81_s1 }
   0x7   :  { %s39_s19 = sadd.f32 -2.5, %s18_s15 }
   0x9   :  { %s20_s20 = smul.f32 %s39_s19, %s39_s19 }
   0xb   :  { %22 = sst [smem:[#allocation4]] %s20_s20 }
   0xc   :  { %31 = dma.smem_to_hbm %s55_s21, 16, %s29_s18, [#allocation5]  }
   0xd   :  { %53 = dma.done.wait [#allocation5], 16  }
   0xe   :  { %54 = vsyncadd [#allocation5], 4294967280 }
   0xf   :  { %36 = sfence }
  0x10   :  { %37 = vsyncpa [#allocation5], 1 }

</bundles_post_ra>
